<compile_context>
chip_gen: v7x
topology: tpu7x:2x2x1
jax: 0.10.0
libtpu: 0.0.40
codegen_flags: <defaults>
</compile_context>

<pallas_src>
import jax
import jax.numpy as jnp
from jax.experimental import pallas as pl
from jax.experimental.pallas import tpu as pltpu


_CHUNK = 512                            # lane width of the partial-sum accumulators
_MAX_CHUNKS = 64                        # cap on unrolled chunks per grid step (TD <= 32768)
_TARGET_BLOCK_ELEMS = (1 << 20) // 4    # ~1 MiB of f32 per input block


def _round_up(x, m):
    return (x + m - 1) // m * m


def _soft_dice_kernel(m1_ref, m2_ref, out_ref, inter_acc, s1_acc, s2_acc):
    j = pl.program_id(1)
    nj = pl.num_programs(1)

    # Start of a new batch row-block: zero the per-sample accumulators.
    @pl.when(j == 0)
    def _():
        inter_acc[...] = jnp.zeros_like(inter_acc)
        s1_acc[...] = jnp.zeros_like(s1_acc)
        s2_acc[...] = jnp.zeros_like(s2_acc)

    tb, td = m1_ref.shape
    chunk = inter_acc.shape[-1]
    k_chunks = td // chunk              # static (<= _MAX_CHUNKS)

    # Elementwise (VPU-only) lane-partial accumulation over the feature tile.
    # Partials live in vregs across the (static, lane-aligned) chunk unroll;
    # only 3 VMEM stores of (tb, chunk) happen per grid step.
    i_p = jnp.zeros((tb, chunk), jnp.float32)
    s1_p = jnp.zeros((tb, chunk), jnp.float32)
    s2_p = jnp.zeros((tb, chunk), jnp.float32)
    for k in range(k_chunks):           # static unroll; lane-aligned ref slices
        a = m1_ref[:, k * chunk:(k + 1) * chunk].astype(jnp.float32)
        b = m2_ref[:, k * chunk:(k + 1) * chunk].astype(jnp.float32)
        i_p = i_p + a * b
        s1_p = s1_p + a
        s2_p = s2_p + b

    inter_acc[...] += i_p
    s1_acc[...] += s1_p
    s2_acc[...] += s2_p

    # Finished the feature (reduction) axis for this batch block: one cross-lane
    # reduce per sample, compute the dice score, write it lane-dense.
    @pl.when(j == nj - 1)
    def _():
        smooth = jnp.float32(1.0)
        inter = jnp.sum(inter_acc[...], axis=-1, keepdims=True)   # (tb, 1)
        s1 = jnp.sum(s1_acc[...], axis=-1, keepdims=True)
        s2 = jnp.sum(s2_acc[...], axis=-1, keepdims=True)
        score = 2.0 * (inter + smooth) / (s1 + s2 + smooth)       # (tb, 1)
        out_ref[...] = jnp.broadcast_to(score, out_ref.shape).astype(out_ref.dtype)


def soft_dice_loss(logits, targets):
    """Pallas implementation of SoftDiceLoss.forward (smooth = 1)."""
    assert logits.shape == targets.shape
    n = logits.shape[0]
    d = 1
    for s in logits.shape[1:]:
        d *= s

    m1 = jnp.asarray(logits).reshape(n, d)
    m2 = jnp.asarray(targets).reshape(n, d)
    if not jnp.issubdtype(m1.dtype, jnp.floating):
        m1 = m1.astype(jnp.float32)
    if not jnp.issubdtype(m2.dtype, jnp.floating):
        m2 = m2.astype(jnp.float32)

    # ---- tile selection ----------------------------------------------------
    if n <= 8:
        tb, n_pad = n, n                      # block row-dim == full array dim
    else:
        tb, n_pad = 8, _round_up(n, 8)        # sublane-aligned batch tiles

    d_ru = _round_up(d, _CHUNK)
    td = min(d_ru,
             _round_up(_TARGET_BLOCK_ELEMS // tb, _CHUNK),
             _CHUNK * _MAX_CHUNKS)
    d_pad = _round_up(d, td)

    if (n_pad, d_pad) != (n, d):
        # Zero padding is exact: padded elements add 0 to every sum and padded
        # rows are dropped before the final mean.
        m1 = jnp.pad(m1, ((0, n_pad - n), (0, d_pad - d)))
        m2 = jnp.pad(m2, ((0, n_pad - n), (0, d_pad - d)))

    grid = (n_pad // tb, d_pad // td)         # reduction (feature) axis LAST

    out = pl.pallas_call(
        _soft_dice_kernel,
        out_shape=jax.ShapeDtypeStruct((n_pad, 128), jnp.float32),
        grid_spec=pltpu.PrefetchScalarGridSpec(
            num_scalar_prefetch=0,
            grid=grid,
            in_specs=[
                pl.BlockSpec((tb, td), lambda i, j: (i, j)),
                pl.BlockSpec((tb, td), lambda i, j: (i, j)),
            ],
            out_specs=pl.BlockSpec((tb, 128), lambda i, j: (i, 0)),
            scratch_shapes=[
                pltpu.VMEM((tb, _CHUNK), jnp.float32),   # intersection partials
                pltpu.VMEM((tb, _CHUNK), jnp.float32),   # m1-sum partials
                pltpu.VMEM((tb, _CHUNK), jnp.float32),   # m2-sum partials
            ],
        ),
        compiler_params=pltpu.CompilerParams(
            dimension_semantics=("parallel", "arbitrary"),
        ),
    )(m1, m2)

    scores = out[:n, 0]                        # per-sample dice scores
    return 1.0 - jnp.sum(scores) / jnp.float32(n)


def _soft_dice_loss_ref(logits, targets):
    n = logits.shape[0]
    smooth = 1.0
    m1 = logits.reshape(n, -1).astype(jnp.float32)
    m2 = targets.reshape(n, -1).astype(jnp.float32)
    inter = (m1 * m2).sum(1)
    score = 2.0 * (inter + smooth) / (m1.sum(1) + m2.sum(1) + smooth)
    return 1.0 - score.sum() / n


if __name__ == "__main__":
    key = jax.random.PRNGKey(0)
    k1, k2 = jax.random.split(key)
    # batch=2, channels=4, spatial=16x16 -> D = 1024 per sample
    logits = jax.random.uniform(k1, (2, 4, 16, 16), dtype=jnp.float32)
    targets = (jax.random.uniform(k2, (2, 4, 16, 16)) > 0.5).astype(jnp.float32)

    loss = soft_dice_loss(logits, targets)
    loss = jax.block_until_ready(loss)

    ref = _soft_dice_loss_ref(logits, targets)
    assert jnp.allclose(loss, ref, rtol=1e-5, atol=1e-5), (loss, ref)
    print("KERNEL_OK")
</pallas_src>

<mosaic_0001>
module attributes {stable_mosaic.version = 11 : i64} {
  func.func @_soft_dice_kernel(%arg0: i32, %arg1: i32, %arg2: memref<2x1024xf32, #tpu.memory_space<vmem>>, %arg3: memref<2x1024xf32, #tpu.memory_space<vmem>>, %arg4: memref<2x128xf32, #tpu.memory_space<vmem>>, %arg5: memref<2x512xf32, #tpu.memory_space<vmem>>, %arg6: memref<2x512xf32, #tpu.memory_space<vmem>>, %arg7: memref<2x512xf32, #tpu.memory_space<vmem>>) attributes {dimension_semantics = [#tpu.dimension_semantics<parallel>, #tpu.dimension_semantics<arbitrary>], iteration_bounds = array<i64: 1, 1>, scalar_prefetch = 0 : i64, scratch_operands = 3 : i64, tpu.core_type = #tpu.core_type<tc>, window_params = [{transform_indices = @transform_0, window_bounds = array<i64: 2, 1024>}, {transform_indices = @transform_1, window_bounds = array<i64: 2, 1024>}, {transform_indices = @transform_2, window_bounds = array<i64: 2, 128>}]} {
    %c0_i32 = arith.constant 0 : i32
    %0 = arith.cmpi eq, %arg1, %c0_i32 : i32
    %1 = arith.extui %0 : i1 to i32
    %c0_i32_0 = arith.constant 0 : i32
    %2 = arith.cmpi ne, %1, %c0_i32_0 : i32
    scf.if %2 {
      %cst_23 = arith.constant 0.000000e+00 : f32
      %30 = vector.broadcast %cst_23 : f32 to vector<2x512xf32>
      %c0_24 = arith.constant 0 : index
      %c0_25 = arith.constant 0 : index
      %31 = vector.load %arg5[%c0_24, %c0_25] : memref<2x512xf32, #tpu.memory_space<vmem>>, vector<2x512xf32>
      tpu.vector_store %arg5[%c0_24, %c0_25], %30 {strides = array<i32>} : memref<2x512xf32, #tpu.memory_space<vmem>>, vector<2x512xf32>,
      %cst_26 = arith.constant 0.000000e+00 : f32
      %32 = vector.broadcast %cst_26 : f32 to vector<2x512xf32>
      %c0_27 = arith.constant 0 : index
      %c0_28 = arith.constant 0 : index
      %33 = vector.load %arg6[%c0_27, %c0_28] : memref<2x512xf32, #tpu.memory_space<vmem>>, vector<2x512xf32>
      tpu.vector_store %arg6[%c0_27, %c0_28], %32 {strides = array<i32>} : memref<2x512xf32, #tpu.memory_space<vmem>>, vector<2x512xf32>,
      %cst_29 = arith.constant 0.000000e+00 : f32
      %34 = vector.broadcast %cst_29 : f32 to vector<2x512xf32>
      %c0_30 = arith.constant 0 : index
      %c0_31 = arith.constant 0 : index
      %35 = vector.load %arg7[%c0_30, %c0_31] : memref<2x512xf32, #tpu.memory_space<vmem>>, vector<2x512xf32>
      tpu.vector_store %arg7[%c0_30, %c0_31], %34 {strides = array<i32>} : memref<2x512xf32, #tpu.memory_space<vmem>>, vector<2x512xf32>,
    } else {
    }
    %cst = arith.constant 0.000000e+00 : f32
    %3 = vector.broadcast %cst : f32 to vector<2x512xf32>
    %cst_1 = arith.constant 0.000000e+00 : f32
    %4 = vector.broadcast %cst_1 : f32 to vector<2x512xf32>
    %cst_2 = arith.constant 0.000000e+00 : f32
    %5 = vector.broadcast %cst_2 : f32 to vector<2x512xf32>
    %c0 = arith.constant 0 : index
    %c0_3 = arith.constant 0 : index
    %6 = vector.load %arg2[%c0, %c0_3] : memref<2x1024xf32, #tpu.memory_space<vmem>>, vector<2x512xf32>
    %c0_4 = arith.constant 0 : index
    %c0_5 = arith.constant 0 : index
    %7 = vector.load %arg3[%c0_4, %c0_5] : memref<2x1024xf32, #tpu.memory_space<vmem>>, vector<2x512xf32>
    %8 = arith.mulf %6, %7 : vector<2x512xf32>
    %9 = arith.addf %3, %8 : vector<2x512xf32>
    %10 = arith.addf %4, %6 : vector<2x512xf32>
    %11 = arith.addf %5, %7 : vector<2x512xf32>
    %c0_6 = arith.constant 0 : index
    %c512 = arith.constant 512 : index
    %12 = vector.load %arg2[%c0_6, %c512] : memref<2x1024xf32, #tpu.memory_space<vmem>>, vector<2x512xf32>
    %c0_7 = arith.constant 0 : index
    %c512_8 = arith.constant 512 : index
    %13 = vector.load %arg3[%c0_7, %c512_8] : memref<2x1024xf32, #tpu.memory_space<vmem>>, vector<2x512xf32>
    %14 = arith.mulf %12, %13 : vector<2x512xf32>
    %15 = arith.addf %9, %14 : vector<2x512xf32>
    %16 = arith.addf %10, %12 : vector<2x512xf32>
    %17 = arith.addf %11, %13 : vector<2x512xf32>
    %c0_9 = arith.constant 0 : index
    %c0_10 = arith.constant 0 : index
    %18 = vector.load %arg5[%c0_9, %c0_10] : memref<2x512xf32, #tpu.memory_space<vmem>>, vector<2x512xf32>
    %19 = arith.addf %18, %15 : vector<2x512xf32>
    %c0_11 = arith.constant 0 : index
    %c0_12 = arith.constant 0 : index
    %20 = vector.load %arg5[%c0_11, %c0_12] : memref<2x512xf32, #tpu.memory_space<vmem>>, vector<2x512xf32>
    tpu.vector_store %arg5[%c0_11, %c0_12], %19 {strides = array<i32>} : memref<2x512xf32, #tpu.memory_space<vmem>>, vector<2x512xf32>,
    %c0_13 = arith.constant 0 : index
    %c0_14 = arith.constant 0 : index
    %21 = vector.load %arg6[%c0_13, %c0_14] : memref<2x512xf32, #tpu.memory_space<vmem>>, vector<2x512xf32>
    %22 = arith.addf %21, %16 : vector<2x512xf32>
    %c0_15 = arith.constant 0 : index
    %c0_16 = arith.constant 0 : index
    %23 = vector.load %arg6[%c0_15, %c0_16] : memref<2x512xf32, #tpu.memory_space<vmem>>, vector<2x512xf32>
    tpu.vector_store %arg6[%c0_15, %c0_16], %22 {strides = array<i32>} : memref<2x512xf32, #tpu.memory_space<vmem>>, vector<2x512xf32>,
    %c0_17 = arith.constant 0 : index
    %c0_18 = arith.constant 0 : index
    %24 = vector.load %arg7[%c0_17, %c0_18] : memref<2x512xf32, #tpu.memory_space<vmem>>, vector<2x512xf32>
    %25 = arith.addf %24, %17 : vector<2x512xf32>
    %c0_19 = arith.constant 0 : index
    %c0_20 = arith.constant 0 : index
    %26 = vector.load %arg7[%c0_19, %c0_20] : memref<2x512xf32, #tpu.memory_space<vmem>>, vector<2x512xf32>
    tpu.vector_store %arg7[%c0_19, %c0_20], %25 {strides = array<i32>} : memref<2x512xf32, #tpu.memory_space<vmem>>, vector<2x512xf32>,
    %c0_i32_21 = arith.constant 0 : i32
    %27 = arith.cmpi eq, %arg1, %c0_i32_21 : i32
    %28 = arith.extui %27 : i1 to i32
    %c0_i32_22 = arith.constant 0 : i32
    %29 = arith.cmpi ne, %28, %c0_i32_22 : i32
    scf.if %29 {
      %c0_23 = arith.constant 0 : index
      %c0_24 = arith.constant 0 : index
      %30 = vector.load %arg5[%c0_23, %c0_24] : memref<2x512xf32, #tpu.memory_space<vmem>>, vector<2x512xf32>
      %cst_25 = arith.constant dense<0.000000e+00> : vector<2xf32>
      %31 = vector.multi_reduction <add>, %30, %cst_25 [1] : vector<2x512xf32> to vector<2xf32>
      %32 = vector.shape_cast %31 : vector<2xf32> to vector<2x1xf32>
      %c0_26 = arith.constant 0 : index
      %c0_27 = arith.constant 0 : index
      %33 = vector.load %arg6[%c0_26, %c0_27] : memref<2x512xf32, #tpu.memory_space<vmem>>, vector<2x512xf32>
      %cst_28 = arith.constant dense<0.000000e+00> : vector<2xf32>
      %34 = vector.multi_reduction <add>, %33, %cst_28 [1] : vector<2x512xf32> to vector<2xf32>
      %35 = vector.shape_cast %34 : vector<2xf32> to vector<2x1xf32>
      %c0_29 = arith.constant 0 : index
      %c0_30 = arith.constant 0 : index
      %36 = vector.load %arg7[%c0_29, %c0_30] : memref<2x512xf32, #tpu.memory_space<vmem>>, vector<2x512xf32>
      %cst_31 = arith.constant dense<0.000000e+00> : vector<2xf32>
      %37 = vector.multi_reduction <add>, %36, %cst_31 [1] : vector<2x512xf32> to vector<2xf32>
      %38 = vector.shape_cast %37 : vector<2xf32> to vector<2x1xf32>
      %cst_32 = arith.constant 1.000000e+00 : f32
      %39 = vector.broadcast %cst_32 : f32 to vector<2x1xf32>
      %40 = arith.addf %32, %39 : vector<2x1xf32>
      %cst_33 = arith.constant 2.000000e+00 : f32
      %41 = vector.broadcast %cst_33 : f32 to vector<2x1xf32>
      %42 = arith.mulf %41, %40 : vector<2x1xf32>
      %43 = arith.addf %35, %38 : vector<2x1xf32>
      %cst_34 = arith.constant 1.000000e+00 : f32
      %44 = vector.broadcast %cst_34 : f32 to vector<2x1xf32>
      %45 = arith.addf %43, %44 : vector<2x1xf32>
      %46 = arith.divf %42, %45 : vector<2x1xf32>
      %47 = vector.shape_cast %46 : vector<2x1xf32> to vector<2x1xf32>
      %48 = vector.broadcast %47 : vector<2x1xf32> to vector<2x128xf32>
      %c0_35 = arith.constant 0 : index
      %c0_36 = arith.constant 0 : index
      %49 = vector.load %arg4[%c0_35, %c0_36] : memref<2x128xf32, #tpu.memory_space<vmem>>, vector<2x128xf32>
      tpu.vector_store %arg4[%c0_35, %c0_36], %48 {strides = array<i32>} : memref<2x128xf32, #tpu.memory_space<vmem>>, vector<2x128xf32>,
    } else {
    }
    return
  }
  func.func @transform_0(%arg0: i32, %arg1: i32) -> (i32, i32) {
    %c0_i32 = arith.constant 0 : i32
    return %arg0, %arg1 : i32, i32
  }
  func.func @transform_1(%arg0: i32, %arg1: i32) -> (i32, i32) {
    %c0_i32 = arith.constant 0 : i32
    return %arg0, %arg1 : i32, i32
  }
  func.func @transform_2(%arg0: i32, %arg1: i32) -> (i32, i32) {
    %c0_i32 = arith.constant 0 : i32
    %c0_i32_0 = arith.constant 0 : i32
    return %arg0, %c0_i32 : i32, i32
  }
}

</mosaic_0001>

<bundles_post_ra>
// kernel: tpu_custom_call.1
= control target key start
LH: loop header
LB: loop body
LE: loop exit
PB: predicated region body
PF: predicated region fallthrough
CT: control target
= control target key end

     0   :  { %7 = vsyncpa [#allocation6], 0  ;;  %s332_s0 = inlined_call_operand.hbm [shape: f32[2,1024], index: 0, kind: input, shape index: {}]   ;;  %s333_s1 = inlined_call_operand.hbm [shape: f32[2,1024], index: 1, kind: input, shape index: {}]   ;;  %s334_s2 = inlined_call_operand.hbm [shape: f32[2,128], index: 2, kind: output, shape index: {}]  }
   0x1   :  { %8 = vsyncpa [#allocation9], 0 }
   0x2   :  { %9 = vsyncpa [#allocation7], 0  ;;  %s265_s9 = smov [#allocation5]   ;;  %s266_s11 = smov [#allocation8]  }
   0x3   :  { %s16_s10 = sshll.u32 %s265_s9, 4  ;;  %s26_s12 = sshll.u32 %s266_s11, 4  ;;  %s17_s10 = int_to_ptr.vmem [resolvable:$true] %s16_s10  ;;  %s27_s12 = int_to_ptr.vmem [resolvable:$true] %s26_s12 }
   0x4   :  { %s193_s15 = scalar_lea.hbm %s332_s0, 256 }
   0x5   :  { %p194_p0 = scmp.ne.s32.totalorder %s332_s0, %s193_s15  ;;  %p197_p1 = scmp.lt.u32.totalorder %s193_s15, %s332_s0 }
   0x7   :  { %p199_p2 = pnand %p197_p1, %p194_p0 }
   0x9   :  { %202 = shalt.err (!%p199_p2)
}
   0xa   :  { %s203_s20 = scalar_lea.vmem %s17_s10, 256  ;;  %p208_p4 = scmp.lt.s32.totalorder %s17_s10, %s17_s10 }
   0xb   :  { %p204_p3 = scmp.ne.s32.totalorder %s17_s10, %s203_s20  ;;  %p209_p5 = scmp.lt.s32.totalorder %s203_s20, %s203_s20 }
   0xd   :  { %p210_p6 = por %p209_p5, %p208_p4 }
   0xf   :  { %p211_p7 = pnand %p210_p6, %p204_p3 }
  0x11   :  { %214 = shalt.err (!%p211_p7)
}
  0x12   :  { %19 = dma.hbm_to_vmem [thread:$0]  %s332_s0, 256, %s17_s10, [#allocation6]  }
  0x13   :  { %s215_s25 = scalar_lea.hbm %s333_s1, 256 }
  0x14   :  { %p216_p8 = scmp.ne.s32.totalorder %s333_s1, %s215_s25  ;;  %p219_p9 = scmp.lt.u32.totalorder %s215_s25, %s333_s1 }
  0x16   :  { %p221_p10 = pnand %p219_p9, %p216_p8 }
  0x18   :  { %224 = shalt.err (!%p221_p10)
}
  0x19   :  { %s225_s30 = scalar_lea.vmem %s27_s12, 256  ;;  %p230_p12 = scmp.lt.s32.totalorder %s27_s12, %s27_s12 }
  0x1a   :  { %p226_p11 = scmp.ne.s32.totalorder %s27_s12, %s225_s30  ;;  %p231_p13 = scmp.lt.s32.totalorder %s225_s30, %s225_s30 }
  0x1c   :  { %p232_p0 = por %p231_p13, %p230_p12 }
  0x1e   :  { %p233_p1 = pnand %p232_p0, %p226_p11 }
  0x20   :  { %236 = shalt.err (!%p233_p1)
}
  0x21   :  { %29 = dma.hbm_to_vmem [thread:$0]  %s333_s1, 256, %s27_s12, [#allocation9]  }
  0x22   :  { %259 = dma.done.wait [#allocation6], 256  }
  0x23   :  { %260 = vsyncadd [#allocation6], 4294967040 }
  0x24   :  { %261 = dma.done.wait [#allocation9], 256  }
  0x25   :  { %262 = vsyncadd [#allocation9], 4294967040  ;;  %v73_v0 = vlaneseq  ;;  %v267_v1 = vmov 1983009808   ;;  %v43_v6 = vld [vmem:[#allocation5] sm:$0xff]  ;;  %v49_v7 = vld [vmem:[#allocation5 + $0x8] sm:$0xff] }
  0x26   :  { %v71_v2 = vunpack.c.l.s4 %v267_v1  ;;  %v44_v8 = vld [vmem:[#allocation8] sm:$0xff]  ;;  %v53_v9 = vadd.f32 %v49_v7, %v43_v6  ;;  %v50_v10 = vld [vmem:[#allocation8 + $0x8] sm:$0xff]  ;;  %vm90_vm0 = vcmask 1041408   ;;  %s268_s1 = smov [#allocation10]  }
  0x27   :  { %v74_v3 = vshrl.u32 %v73_v0, 7  ;;  %v45_v11 = vmul.f32 %v44_v8, %v43_v6  ;;  %v54_v12 = vadd.f32 %v50_v10, %v44_v8  ;;  %v51_v13 = vmul.f32 %v50_v10, %v49_v7  ;;  %s177_s4 = sshll.u32 %s268_s1, 4  ;;  %s178_s4 = int_to_ptr.vmem [resolvable:$true] %s177_s4 }
  0x28   :  { %v72_v4 = vunpack.c.0.s8 %v71_v2  ;;  %v102_v14 = vcombine.high %v53_v9, %v53_v9  ;;  %s237_s5 = scalar_lea.vmem %s178_s4, 32  ;;  %p242_p3 = scmp.lt.s32.totalorder %s178_s4, %s178_s4 }
  0x29   :  { %v134_v16 = vcombine.high %v54_v12, %v54_v12  ;;  %v52_v18 = vadd.f32 %v51_v13, %v45_v11  ;;  %p238_p2 = scmp.ne.s32.totalorder %s178_s4, %s237_s5  ;;  %p243_p4 = scmp.lt.s32.totalorder %s237_s5, %s237_s5 }
  0x2a   :  { %v75_v5 = vsub.s32 %v72_v4, %v74_v3 }
  0x2b   :  { %v69_v25 = vcombine.high %v52_v18, %v52_v18  ;;  %p244_p5 = por %p243_p4, %p242_p3 }
  0x2c   :  { %v109_v15 = vrot.slane %v53_v9, %v75_v5  ;;  %v141_v17 = vrot.slane %v54_v12, %v75_v5  ;;  %v116_v19 = vrot.slane %v102_v14, %v75_v5  ;;  %v148_v22 = vrot.slane %v134_v16, %v75_v5 }
  0x2d   :  { %v76_v29 = vrot.slane %v52_v18, %v75_v5  ;;  %v83_v36 = vrot.slane %v69_v25, %v75_v5  ;;  %p245_p6 = pnand %p244_p5, %p238_p2 }
  0x2e   :  { %v117_v20 = vcombine.high %v109_v15, %v109_v15  ;;  %v123_v21 = vsel %vm90_vm0, %v109_v15, 0.0  ;;  %v149_v23 = vcombine.high %v141_v17, %v141_v17  ;;  %v155_v24 = vsel %vm90_vm0, %v141_v17, 0.0 }
  0x2f   :  { %v118_v26 = vcombine.high %v116_v19, %v116_v19  ;;  %v126_v28 = vsel %vm90_vm0, %v116_v19, 0.0  ;;  %v150_v31 = vcombine.high %v148_v22, %v148_v22  ;;  %v158_v33 = vsel %vm90_vm0, %v148_v22, 0.0 }
  0x30   :  { %v124_v27 = vsel %vm90_vm0, %v117_v20, 0.0  ;;  %v156_v32 = vsel %vm90_vm0, %v149_v23, 0.0  ;;  %v84_v37 = vcombine.high %v76_v29, %v76_v29  ;;  %v91_v40 = vsel %vm90_vm0, %v76_v29, 0.0 }
  0x31   :  { %v125_v30 = vadd.f32 %v124_v27, %v123_v21  ;;  %v128_v34 = vsel %vm90_vm0, %v118_v26, 0.0  ;;  %v157_v35 = vadd.f32 %v156_v32, %v155_v24  ;;  %v160_v39 = vsel %vm90_vm0, %v150_v31, 0.0 }
  0x32   :  { %v85_v42 = vcombine.high %v83_v36, %v83_v36  ;;  %v92_v43 = vsel %vm90_vm0, %v84_v37, 0.0  ;;  %v94_v44 = vsel %vm90_vm0, %v83_v36, 0.0 }
  0x33   :  { %v127_v38 = vadd.f32 %v126_v28, %v125_v30  ;;  %v159_v41 = vadd.f32 %v158_v33, %v157_v35  ;;  %v93_v46 = vadd.f32 %v92_v43, %v91_v40 }
  0x34   :  { %v96_v47 = vsel %vm90_vm0, %v85_v42, 0.0 }
  0x35   :  { %v129_v45 = vadd.f32 %v128_v34, %v127_v38  ;;  %v161_v48 = vadd.f32 %v160_v39, %v159_v41  ;;  %v95_v49 = vadd.f32 %v94_v44, %v93_v46 }
  0x37   :  { %130 = vadd.xlane.f32.xlu0 %v129_v45  ;;  %v97_v50 = vadd.f32 %v96_v47, %v95_v49 }
  0x39   :  { %98 = vadd.xlane.f32.xlu1 %v97_v50 }
  0x3b   :  { %162 = vadd.xlane.f32.xlu0 %v161_v48 }
  0xc4   :  { %v131_v51 = vpop.xlane.xlu0 %130 }
  0xc6   :  { %v99_v55 = vpop.xlane.xlu1 %98 }
  0xc7   :  { %v164_v56 = vadd.f32 1.0, %v99_v55 }
  0xc8   :  { %v163_v52 = vpop.xlane.xlu0 %162 }
  0xc9   :  { %v166_v53 = vadd.f32 %v163_v52, %v131_v51  ;;  %v165_v57 = vmul.f32 2.0, %v164_v56 }
  0xcb   :  { %v167_v54 = vadd.f32 1.0, %v166_v53 }
  0xcd   :  { %191 = vrcp.f32 %v167_v54 }
  0xd7   :  { %v192_v58 = vpop.eup %191 }
  0xd8   :  { %v169_v59 = vmul.f32 %v192_v58, %v165_v57 }
  0xda   :  { %170 = vst [vmem:[#allocation10] sm:$0x3] %v169_v59 }
  0xdb   :  { %248 = shalt.err (!%p245_p6)
}
  0xdc   :  { %s249_s8 = scalar_lea.hbm %s334_s2, 32 }
  0xdd   :  { %p250_p7 = scmp.ne.s32.totalorder %s334_s2, %s249_s8  ;;  %p253_p8 = scmp.lt.u32.totalorder %s249_s8, %s334_s2 }
  0xdf   :  { %p255_p9 = pnand %p253_p8, %p250_p7 }
  0xe1   :  { %258 = shalt.err (!%p255_p9)
}
  0xe2   :  { %180 = dma.vmem_to_hbm [thread:$0]  %s178_s4, 32, %s334_s2, [#allocation7]  }
  0xe3   :  { %263 = dma.done.wait [#allocation7], 32  }
  0xe4   :  { %264 = vsyncadd [#allocation7], 4294967264 }
  0xe5   :  { %184 = vsyncpa [#allocation6], 1 }
  0xe6   :  { %185 = vsyncpa [#allocation9], 1 }
  0xe7   :  { %186 = vsyncpa [#allocation7], 1 }

</bundles_post_ra>
